<compile_context>
chip_gen: v7x
topology: tpu7x:2x2x1
jax: 0.10.0
libtpu: 0.0.40
codegen_flags: <defaults>
</compile_context>

<pallas_src>
import functools

import jax
import jax.numpy as jnp
from jax.experimental import pallas as pl
from jax.experimental.pallas import tpu as pltpu


def _round_up(x, m):
    return ((x + m - 1) // m) * m


def _vmem_capacity_bytes():
    try:
        return int(pltpu.get_tpu_info().vmem_capacity_bytes)
    except Exception:
        return 64 * 1024 * 1024  # conservative: v7x per-TC physical VMEM


def _zero_projection_kernel(idx_ref, w_ref, out_ref, *, e_chunk):
    """One-hot MXU gather of a tile of rows from the VMEM-resident weight.

    idx_ref : VMEM (tb, 1) int32  -- flattened indices for this tile
    w_ref   : VMEM (E, H)  f32    -- full weight table (constant block, single-buffered)
    out_ref : VMEM (tb, H) f32    -- gathered rows
    """
    tb = idx_ref.shape[0]
    e, h = w_ref.shape
    idx = idx_ref[...]                                   # (tb, 1) int32
    acc = jnp.zeros((tb, h), jnp.float32)
    # Static Python loop over E-chunks keeps the (tb, chunk) one-hot intermediate
    # bounded in VMEM/VALU even for large tables; a single iteration when e <= e_chunk.
    for e0 in range(0, e, e_chunk):
        ce = min(e_chunk, e - e0)
        iota = jax.lax.broadcasted_iota(jnp.int32, (tb, ce), 1) + e0
        # 0/1 one-hot is exact in the weight dtype (bf16 weights would give the native
        # bf16 MXU path automatically).  Indices outside [e0, e0+ce) contribute zero.
        onehot = (iota == idx).astype(w_ref.dtype)
        acc = acc + jnp.dot(onehot, w_ref[e0:e0 + ce, :],
                            preferred_element_type=jnp.float32)
    out_ref[...] = acc.astype(out_ref.dtype)


def zero_projection(x, weight, *, tb=1024):
    """Pallas equivalent of ZeroProjection.forward.

    x      : integer array of any shape
    weight : (expanded_dim, hidden_dim) float32
    returns: float32 array of shape x.shape + (hidden_dim,)
    """
    e, h = weight.shape
    itemsize = jnp.dtype(weight.dtype).itemsize
    h_pad = _round_up(h, 128)
    e_pad = _round_up(e, 8)

    orig_shape = x.shape
    idx = x.reshape(-1).astype(jnp.int32)
    n = idx.shape[0]
    idx2d = idx.reshape(n, 1)

    # Weight table spec: constant block index -> single-buffer it if supported.
    try:
        w_spec = pl.BlockSpec((e, h), lambda i: (0, 0), pipeline_mode=pl.Buffered(1))
        w_bufs = 1
    except Exception:  # older JAX without pipeline_mode / Buffered
        w_spec = pl.BlockSpec((e, h), lambda i: (0, 0))
        w_bufs = 2

    cap = _vmem_capacity_bytes()
    budget = (cap * 3) // 4  # ~25% headroom below physical VMEM

    table_vmem = w_bufs * e_pad * h_pad * itemsize
    # TODO(synk): route larger tables to a row-DMA / scalar-prefetch gather instead
    # of asserting; the VMEM-resident one-hot path needs the table on-chip.
    assert table_vmem <= budget // 2, (
        "weight table too large for the VMEM-resident one-hot gather path"
    )

    e_chunk = 512  # multiple of 256 -> native MXU contraction width on v6e/v7x (128 on v5e)

    def _need_bytes(tbe):
        idx_vmem = 2 * tbe * 128 * 4                     # (tbe,1) int32 block, lane-padded, 2x buffered
        out_vmem = 2 * tbe * h_pad * itemsize            # double-buffered output tile
        onehot_vmem = tbe * min(e_pad, _round_up(e_chunk, 128)) * itemsize
        acc_vmem = tbe * h_pad * 4
        slack = 2 * 1024 * 1024                          # compiler-internal scratch / spills
        return table_vmem + idx_vmem + out_vmem + 2 * (onehot_vmem + acc_vmem) + slack

    # Tile choice: biggest tile up to tb that fits the budget; tiny inputs become a
    # single small grid step, inputs with n > tb rows get >= 2 steps (v7x megacore).
    tb_eff = max(8, min(int(tb), _round_up(n, 8)))
    while _need_bytes(tb_eff) > budget and tb_eff > 8:
        tb_eff = max(8, _round_up(tb_eff // 2, 8))

    grid = (pl.cdiv(n, tb_eff),)
    vmem_limit = min(budget, max(int(_need_bytes(tb_eff) * 1.25), 8 * 1024 * 1024))

    out = pl.pallas_call(
        functools.partial(_zero_projection_kernel, e_chunk=e_chunk),
        out_shape=jax.ShapeDtypeStruct((n, h), weight.dtype),
        grid_spec=pltpu.PrefetchScalarGridSpec(
            num_scalar_prefetch=0,
            grid=grid,
            in_specs=[
                # Index tile for this grid step.
                pl.BlockSpec((tb_eff, 1), lambda i: (i, 0)),
                # Whole weight table resident in VMEM (constant block index).
                w_spec,
            ],
            out_specs=pl.BlockSpec((tb_eff, h), lambda i: (i, 0)),
        ),
        compiler_params=pltpu.CompilerParams(
            # Disjoint output tiles, no accumulator -> parallel (2 TCs on v7x).
            dimension_semantics=("parallel",),
            vmem_limit_bytes=int(vmem_limit),
        ),
    )(idx2d, weight)

    return out.reshape(orig_shape + (h,))


if __name__ == "__main__":
    # Module config (small, consistent with ZeroProjection(expanded_dim, hidden_dim)).
    expanded_dim = 32
    hidden_dim = 128

    key = jax.random.PRNGKey(0)
    k_w, k_x1, k_x2, k_x3 = jax.random.split(key, 4)

    # NOTE: the PyTorch module initializes its weight to zeros (trained later).
    # We use a deterministic non-zero weight so the gather is actually exercised;
    # jnp.zeros((expanded_dim, hidden_dim)) would match __init__ exactly.
    weight = jax.random.normal(k_w, (expanded_dim, hidden_dim), dtype=jnp.float32)

    # Jit the wrapper so the flatten/reshape around the pallas_call fuses (no extra
    # host-side HBM round trips).
    zp = jax.jit(zero_projection)

    # Case 1: small index tensor, e.g. (batch=2, seq=8) token ids -> single tiny step.
    x1 = jax.random.randint(k_x1, (2, 8), 0, expanded_dim, dtype=jnp.int32)
    out1 = jax.block_until_ready(zp(x1, weight))
    ref1 = jnp.take(weight, x1.reshape(-1), axis=0).reshape(x1.shape + (hidden_dim,))
    assert out1.shape == x1.shape + (hidden_dim,), out1.shape
    assert out1.dtype == jnp.float32
    assert jnp.allclose(out1, ref1), "mismatch vs reference gather (case 1)"

    # Case 2: medium index tensor (800 rows), still a single big tile.
    x2 = jax.random.randint(k_x2, (4, 200), 0, expanded_dim, dtype=jnp.int32)
    out2 = jax.block_until_ready(zp(x2, weight))
    ref2 = jnp.take(weight, x2.reshape(-1), axis=0).reshape(x2.shape + (hidden_dim,))
    assert out2.shape == x2.shape + (hidden_dim,), out2.shape
    assert jnp.allclose(out2, ref2), "mismatch vs reference gather (case 2)"

    # Case 3: multi-step grid with a ragged last block (2500 rows -> 3 steps of 1024),
    # exercising the no-pad / masked-tail path.
    x3 = jax.random.randint(k_x3, (5, 500), 0, expanded_dim, dtype=jnp.int32)
    out3 = jax.block_until_ready(zp(x3, weight))
    ref3 = jnp.take(weight, x3.reshape(-1), axis=0).reshape(x3.shape + (hidden_dim,))
    assert out3.shape == x3.shape + (hidden_dim,), out3.shape
    assert jnp.allclose(out3, ref3), "mismatch vs reference gather (case 3)"

    print("KERNEL_OK")
</pallas_src>

<mosaic_0001>
module attributes {stable_mosaic.version = 11 : i64} {
  func.func @_zero_projection_kernel(%arg0: i32, %arg1: memref<16x1xi32, #tpu.memory_space<vmem>>, %arg2: memref<32x128xf32, #tpu.memory_space<vmem>>, %arg3: memref<16x128xf32, #tpu.memory_space<vmem>>) attributes {dimension_semantics = [#tpu.dimension_semantics<parallel>], iteration_bounds = array<i64: 1>, scalar_prefetch = 0 : i64, scratch_operands = 0 : i64, tpu.core_type = #tpu.core_type<tc>, window_params = [{transform_indices = @transform_0, window_bounds = array<i64: 16, 1>}, {pipeline_mode = #tpu.pipeline_mode<synchronous>, transform_indices = @transform_1, window_bounds = array<i64: 32, 128>}, {transform_indices = @transform_2, window_bounds = array<i64: 16, 128>}]} {
    %c0 = arith.constant 0 : index
    %c0_0 = arith.constant 0 : index
    %0 = vector.load %arg1[%c0, %c0_0] : memref<16x1xi32, #tpu.memory_space<vmem>>, vector<16x1xi32>
    %cst = arith.constant 0.000000e+00 : f32
    %1 = vector.broadcast %cst : f32 to vector<16x128xf32>
    %2 = tpu.iota {dimensions = array<i32: 1>} : vector<16x32xi32>
    %c0_i32 = arith.constant 0 : i32
    %3 = vector.broadcast %c0_i32 : i32 to vector<16x32xi32>
    %4 = arith.addi %2, %3 : vector<16x32xi32>
    %5 = vector.broadcast %0 : vector<16x1xi32> to vector<16x32xi32>
    %6 = arith.cmpi eq, %4, %5 : vector<16x32xi32>
    %7 = arith.extui %6 : vector<16x32xi1> to vector<16x32xi32>
    %8 = arith.sitofp %7 : vector<16x32xi32> to vector<16x32xf32>
    %c0_1 = arith.constant 0 : index
    %c0_2 = arith.constant 0 : index
    %9 = vector.load %arg2[%c0_1, %c0_2] : memref<32x128xf32, #tpu.memory_space<vmem>>, vector<32x128xf32>
    %cst_3 = arith.constant dense<0.000000e+00> : vector<16x128xf32>
    %10 = tpu.matmul %8, %9, %cst_3 {dimension_numbers = #tpu.dot_dimension_numbers<[1], [0], [0], [1], [0, 0, 1, 1], [], []>} : vector<16x32xf32>, vector<32x128xf32>, vector<16x128xf32> -> vector<16x128xf32>
    %11 = arith.addf %1, %10 : vector<16x128xf32>
    %c0_4 = arith.constant 0 : index
    %c0_5 = arith.constant 0 : index
    %12 = vector.load %arg3[%c0_4, %c0_5] : memref<16x128xf32, #tpu.memory_space<vmem>>, vector<16x128xf32>
    tpu.vector_store %arg3[%c0_4, %c0_5], %11 {strides = array<i32>} : memref<16x128xf32, #tpu.memory_space<vmem>>, vector<16x128xf32>,
    return
  }
  func.func @transform_0(%arg0: i32) -> (i32, i32) {
    %c0_i32 = arith.constant 0 : i32
    %c0_i32_0 = arith.constant 0 : i32
    return %arg0, %c0_i32 : i32, i32
  }
  func.func @transform_1(%arg0: i32) -> (i32, i32) {
    %c0_i32 = arith.constant 0 : i32
    %c0_i32_0 = arith.constant 0 : i32
    %c0_i32_1 = arith.constant 0 : i32
    return %c0_i32, %c0_i32_0 : i32, i32
  }
  func.func @transform_2(%arg0: i32) -> (i32, i32) {
    %c0_i32 = arith.constant 0 : i32
    %c0_i32_0 = arith.constant 0 : i32
    return %arg0, %c0_i32 : i32, i32
  }
}

</mosaic_0001>

<bundles_post_ra>
// kernel: zero_projection.1
= control target key start
LH: loop header
LB: loop body
LE: loop exit
PB: predicated region body
PF: predicated region fallthrough
CT: control target
= control target key end

     0   :  { %7 = vsyncpa [#allocation3], 0  ;;  %s288_s0 = inlined_call_operand.vmem [shape: s32[16,1], index: 0, kind: input, shape index: {}]   ;;  %s289_s1 = inlined_call_operand.hbm [shape: f32[32,128], index: 1, kind: input, shape index: {}]   ;;  %s290_s2 = inlined_call_operand.hbm [shape: f32[16,128], index: 2, kind: output, shape index: {}]  }
   0x1   :  { %8 = vsyncpa [#allocation4], 0  ;;  %s231_s9 = smov [#allocation2]   ;;  %s183_s13 = scalar_lea.hbm %s289_s1, 512 }
   0x2   :  { %s16_s10 = sshll.u32 %s231_s9, 4  ;;  %p184_p0 = scmp.ne.s32.totalorder %s289_s1, %s183_s13  ;;  %s17_s10 = int_to_ptr.vmem [resolvable:$true] %s16_s10 }
   0x3   :  { %p187_p1 = scmp.lt.u32.totalorder %s183_s13, %s289_s1 }
   0x5   :  { %p189_p2 = pnand %p187_p1, %p184_p0 }
   0x7   :  { %192 = shalt.err (!%p189_p2)
}
   0x8   :  { %s193_s18 = scalar_lea.vmem %s17_s10, 512  ;;  %p198_p4 = scmp.lt.s32.totalorder %s17_s10, %s17_s10 }
   0x9   :  { %p194_p3 = scmp.ne.s32.totalorder %s17_s10, %s193_s18  ;;  %p199_p5 = scmp.lt.s32.totalorder %s193_s18, %s193_s18 }
   0xb   :  { %p200_p6 = por %p199_p5, %p198_p4 }
   0xd   :  { %p201_p7 = pnand %p200_p6, %p194_p3 }
   0xf   :  { %204 = shalt.err (!%p201_p7)
}
  0x10   :  { %s232_s19 = smov 128   ;;  %s233_s20 = smov 8  }
  0x11   :  { %22 = dma.hbm_to_vmem [thread:$0]  %s289_s1, 512, %s17_s10, [#allocation3], %s232_s19, %s232_s19, %s233_s20  }
  0x12   :  { %227 = dma.done.wait [#allocation3], 512  }
  0x13   :  { %228 = vsyncadd [#allocation3], 4294966784  ;;  %v234_v0 = vmov 0   ;;  %v26_v1 = vld [vmem:[%s288_s0] sm:$0xff]  ;;  %v43_v3 = vld [vmem:[#allocation2 + $0x8] sm:$0xff]  ;;  %v28_v9 = vlaneseq  ;;  %vm46_vm0 = vcmask 261120  }
  0x14   :  { %182 = vset.pattern.permute.xlu0 %v234_v0  ;;  %v42_v2 = vld [vmem:[#allocation2] sm:$0xff]  ;;  %v44_v4 = vld [vmem:[#allocation2 + $0x10] sm:$0xff]  ;;  %v45_v5 = vld [vmem:[#allocation2 + $0x18] sm:$0xff]  ;;  %v235_v12 = vmov 0.0  }
  0x15   :  { %31 = vperm.xlu0 %182, %v26_v1   ;;  %v27_v6 = vld [vmem:[%s288_s0 + $0x8] sm:$0xff]  ;;  %v168_v7 = vpack.c.bf16 %v43_v3, %v42_v2  ;;  %v172_v8 = vpack.c.bf16 %v45_v5, %v44_v4  ;;  %v29_v10 = vand.u32 127, %v28_v9  ;;  %s236_s0 = smov [#allocation5]  }
  0x16   :  { %s135_s1 = sshll.u32 %s236_s0, 4  ;;  %s136_s1 = int_to_ptr.vmem [resolvable:$true] %s135_s1 }
  0x17   :  { %169 = vmatprep.subr.bf16.mxu0 %v168_v7  ;;  %s205_s27 = scalar_lea.vmem %s136_s1, 256  ;;  %p210_p9 = scmp.lt.s32.totalorder %s136_s1, %s136_s1 }
  0x18   :  { %171 = vmatpush3.bf16.msra.mxu0 %v168_v7  ;;  %p206_p8 = scmp.ne.s32.totalorder %s136_s1, %s205_s27  ;;  %p211_p10 = scmp.lt.s32.totalorder %s205_s27, %s205_s27 }
  0x19   :  { %34 = vperm.xlu0 %182, %v27_v6   ;;  %173 = vmatprep.subr.bf16.mxu0 %v172_v8 }
  0x1a   :  { %p212_p11 = por %p211_p10, %p210_p9 }
  0x1c   :  { %175 = vmatpush3.bf16.msra.mxu0 %v172_v8  ;;  %p213_p12 = pnand %p212_p11, %p206_p8 }
  0x94   :  { %v32_v11 = vpop.permute.xlu0 %31 }
  0x95   :  { %vm36_vm1 = vcmp.eq.s32.totalorder %v29_v10, %v32_v11 }
  0x96   :  { %v147_v13 = vsel %vm36_vm1, 1.0, %v235_v12 }
  0x97   :  { %165 = vmatprep.mubr.msk.f32.mxu0 %vm46_vm0, %v147_v13 }
  0x98   :  { %v35_v14 = vpop.permute.xlu0 %34 }
  0x99   :  { %vm37_vm2 = vcmp.eq.s32.totalorder %v29_v10, %v35_v14 }
  0x9a   :  { %v148_v15 = vsel %vm37_vm2, 1.0, %v235_v12 }
  0x9b   :  { %166 = vmatmul.mubr.msk.f32.vlgmr.msra.gmra.mrb[0].mxu0 %vm46_vm0, %v148_v15 }
 0x16e   :  { %v167_v16 = vpop.f32.mrb[0].mxu0 }
 0x16f   :  { %129 = vst [vmem:[#allocation5 + $0x8] sm:$0xff] %v167_v16  ;;  %v119_v17 = vpop.f32.mrb[1].mxu0 }
 0x170   :  { %128 = vst [vmem:[#allocation5] sm:$0xff] %v119_v17 }
 0x171   :  { %216 = shalt.err (!%p213_p12)
}
 0x172   :  { %s217_s30 = scalar_lea.hbm %s290_s2, 256 }
 0x173   :  { %p218_p13 = scmp.ne.s32.totalorder %s290_s2, %s217_s30  ;;  %p221_p0 = scmp.lt.u32.totalorder %s217_s30, %s290_s2 }
 0x175   :  { %p223_p1 = pnand %p221_p0, %p218_p13 }
 0x177   :  { %226 = shalt.err (!%p223_p1)
}
 0x178   :  { %141 = dma.vmem_to_hbm [thread:$0]  %s136_s1, 256, %s290_s2, [#allocation4], %s232_s19, %s232_s19, %s233_s20  }
 0x179   :  { %229 = dma.done.wait [#allocation4], 256  }
 0x17a   :  { %230 = vsyncadd [#allocation4], 4294967040 }
 0x17b   :  { %145 = vsyncpa [#allocation3], 1 }
 0x17c   :  { %146 = vsyncpa [#allocation4], 1 }

</bundles_post_ra>
